<compile_context>
chip_gen: v7x
topology: tpu7x:2x2x1
jax: 0.10.0
libtpu: 0.0.40
codegen_flags: <defaults>
</compile_context>

<pallas_src>
import numpy as np
import jax
import jax.numpy as jnp
from jax.experimental import pallas as pl
from jax.experimental.pallas import tpu as pltpu

OUT_HW = 224            # TF.resize target
PATCH = 32              # synthetic patch size -> 7x7 patches
GRID = OUT_HW // PATCH  # 7
EMBED_DIM = 32          # joint image/text embedding dim
TXT_DIM = 48            # text token embedding dim
VOCAB = 64              # synthetic vocab

IMAGENET_MEAN = np.array([0.485, 0.456, 0.406], dtype=np.float64)
IMAGENET_STD = np.array([0.229, 0.224, 0.225], dtype=np.float64)


def bicubic_resize_matrix(n_in, n_out, a=-0.75):
    """(n_out, n_in) matrix reproducing bicubic resize (half-pixel centers,
    Keys kernel a=-0.75, replicate border) - matches PyTorch bicubic interp
    without antialiasing (fine here: this path always upsamples 16 -> 224)."""
    def cubic(x):
        x = abs(float(x))
        if x <= 1.0:
            return (a + 2.0) * x**3 - (a + 3.0) * x**2 + 1.0
        if x < 2.0:
            return a * x**3 - 5.0 * a * x**2 + 8.0 * a * x - 4.0 * a
        return 0.0

    scale = n_in / n_out
    m = np.zeros((n_out, n_in), dtype=np.float64)
    for i in range(n_out):
        src = (i + 0.5) * scale - 0.5
        i0 = int(np.floor(src))
        t = src - i0
        for off in (-1, 0, 1, 2):
            w = cubic(t - off)
            idx = min(max(i0 + off, 0), n_in - 1)
            m[i, idx] += w
    return m


def build_image_embed_constants(C, H, W, w_patch_np):
    """Host precomposition of the full image-side linear chain.

    For channel c (rows of bicubic / pool matrices sum to 1, so the (x+1)*0.5
    affine and the mean/std normalize commute exactly):
        pooled_c = Mv_c @ x_c @ Mh + b_c * J
        Mv_c = s_c * (A @ RH)   (PATCH, H)     s_c = 0.5/std_c
        Mh   = RW^T @ A^T       (W, PATCH)     b_c = (0.5-mean_c)/std_c
    Folding the patch-embed w_patch as well gives a single exact map
        img_emb = x_flat @ G + bias_emb
        G[(c,i,j), e]   = s_c * sum_{p,q} Mv[p,i] * Mh[j,q] * w_patch[(c,p,q), e]
        bias_emb[e]     = sum_{c,p,q} b_c * w_patch[(c,p,q), e]
    """
    rh = bicubic_resize_matrix(H, OUT_HW)          # (224, H)
    rw = bicubic_resize_matrix(W, OUT_HW)          # (224, W)

    # 7x7 patch-grid mean pool (synthetic encoder), separable
    A = np.zeros((PATCH, OUT_HW), dtype=np.float64)
    for g in range(GRID):
        A[np.arange(PATCH), g * PATCH + np.arange(PATCH)] = 1.0 / GRID

    mv = A @ rh          # (PATCH, H)
    mh = rw.T @ A.T      # (W, PATCH)

    s = 0.5 / IMAGENET_STD                   # (C,)
    b = (0.5 - IMAGENET_MEAN) / IMAGENET_STD  # (C,)

    w4 = np.asarray(w_patch_np, dtype=np.float64).reshape(C, PATCH, PATCH, EMBED_DIM)

    # G4[c,i,j,e] = s_c * sum_{p,q} mv[p,i] * mh[j,q] * w4[c,p,q,e]
    g4 = np.einsum('pi,jq,cpqe->cije', mv, mh, w4, optimize=True)
    g4 = g4 * s[:, None, None, None]
    g_mat = g4.reshape(C * H * W, EMBED_DIM).astype(np.float32)      # (768, 32)

    bias_emb = np.einsum('c,cpqe->e', b, w4, optimize=True).astype(np.float32)

    return jnp.asarray(g_mat), jnp.asarray(bias_emb).reshape(1, EMBED_DIM)


# -----------------------------------------------------------------------------
# Single Pallas kernel: per-batch-block image embedding
#   (x+1)*0.5 -> bicubic 224 -> normalize -> 7x7 patch mean-pool -> patch embed
# realized exactly as   x_flat @ G + bias_emb.
# -----------------------------------------------------------------------------
def _img_embed_kernel(x_ref, g_ref, bias_ref, o_ref):
    # x_ref:    (Bblk, 1, C*H*W)   flattened images (lane dim 768 = 6*128)
    # g_ref:    (C*H*W, E)         precomposed image->embedding matrix (f32)
    # bias_ref: (1, E)             precomposed normalize bias @ patch-embed
    # o_ref:    (Bblk, 1, E)       image embeddings
    x = x_ref[:, 0, :]
    emb = jnp.dot(x, g_ref[...], preferred_element_type=jnp.float32)
    o_ref[:, 0, :] = emb + bias_ref[...]


def _pick_batch_block(B):
    # >=2 "parallel" grid steps whenever B>=2 (v7x has 2 TensorCores); up to 8
    # images per step to amortize per-step overhead on single-TC v5e/v6e.
    if B <= 1:
        return 1
    upper = max(1, min(8, B // 2))
    for blk in range(upper, 0, -1):
        if B % blk == 0:
            return blk
    return 1


def image_embed(x, g_mat, bias_emb):
    B, C, H, W = x.shape
    chw = C * H * W
    E = g_mat.shape[1]
    x_flat = x.reshape(B, 1, chw)          # contiguous-dim merge, free in XLA
    b_blk = _pick_batch_block(B)
    grid = (B // b_blk,)

    flops = 2 * B * chw * E
    bytes_accessed = 4 * (B * chw + chw * E + E + B * E)

    out = pl.pallas_call(
        _img_embed_kernel,
        out_shape=jax.ShapeDtypeStruct((B, 1, E), jnp.float32),
        grid=grid,
        in_specs=[
            pl.BlockSpec((b_blk, 1, chw), lambda i: (i, 0, 0)),
            pl.BlockSpec((chw, E), lambda i: (0, 0)),       # resident constant
            pl.BlockSpec((1, E), lambda i: (0, 0)),         # resident constant
        ],
        out_specs=pl.BlockSpec((b_blk, 1, E), lambda i: (i, 0, 0)),
        compiler_params=pltpu.CompilerParams(
            dimension_semantics=("parallel",)),
        cost_estimate=pl.CostEstimate(flops=flops, transcendentals=0,
                                      bytes_accessed=bytes_accessed),
    )(x_flat, g_mat, bias_emb)
    return out.reshape(B, E)


# -----------------------------------------------------------------------------
# Full forward = Clip.forward with the synthetic CLIP model
# -----------------------------------------------------------------------------
def clip_forward(x, y, params):
    # image side: whole preprocessing + encoder chain inside one Pallas call
    img_emb = image_embed(x, params["img_embed_w"], params["img_embed_b"])  # (B, E)

    # text encoder (synthetic): token embedding lookup + mean pool + projection.
    # Per perf review this tail (plus normalize / logits / negation) is a few
    # hundred FLOPs and launch-bound as a kernel, so it is left to XLA fusion.
    txt_tok = jnp.take(params["tok_emb"], y, axis=0)        # (Bt, L, TXT_DIM)
    txt_pool = jnp.mean(txt_tok, axis=1)                    # (Bt, TXT_DIM)
    txt_emb = txt_pool @ params["w_txt"]                    # (Bt, E)

    img_n = img_emb / jnp.linalg.norm(img_emb, axis=-1, keepdims=True)
    txt_n = txt_emb / jnp.linalg.norm(txt_emb, axis=-1, keepdims=True)

    logits_per_image = params["logit_scale_exp"][0] * (img_n @ txt_n.T)
    return -logits_per_image


if __name__ == "__main__":
    key = jax.random.PRNGKey(0)
    k_x, k_y, k_patch, k_tok, k_txt = jax.random.split(key, 5)

    B, C, H, W = 2, 3, 16, 16   # small input image, RGB (required by Normalize)
    Bt, L = 2, 8                # text tokens

    x = jax.random.uniform(k_x, (B, C, H, W), jnp.float32, -1.0, 1.0)
    y = jax.random.randint(k_y, (Bt, L), 0, VOCAB)

    w_patch = 0.02 * jax.random.normal(
        k_patch, (C * PATCH * PATCH, EMBED_DIM), jnp.float32)

    # host precomposition of preprocess + pool + patch-embed (exact, f32)
    g_mat, bias_emb = build_image_embed_constants(C, H, W, np.asarray(w_patch))

    params = {
        "img_embed_w": g_mat,                               # (C*H*W, E) f32
        "img_embed_b": bias_emb,                            # (1, E) f32
        "tok_emb": 0.02 * jax.random.normal(
            k_tok, (VOCAB, TXT_DIM), jnp.float32),
        "w_txt": 0.02 * jax.random.normal(
            k_txt, (TXT_DIM, EMBED_DIM), jnp.float32),
        "logit_scale_exp": jnp.asarray(
            [np.exp(np.log(1.0 / 0.07))], dtype=jnp.float32),
    }

    out = jax.jit(clip_forward)(x, y, params)
    out = jax.block_until_ready(out)
    assert out.shape == (B, Bt) and out.dtype == jnp.float32
    assert bool(jnp.all(jnp.isfinite(out)))
    print("KERNEL_OK")
</pallas_src>

<mosaic_0001>
module attributes {stable_mosaic.version = 11 : i64} {
  func.func @_img_embed_kernel(%arg0: i32, %arg1: memref<1x1x768xf32, #tpu.memory_space<vmem>>, %arg2: memref<768x32xf32, #tpu.memory_space<vmem>>, %arg3: memref<1x32xf32, #tpu.memory_space<vmem>>, %arg4: memref<1x1x32xf32, #tpu.memory_space<vmem>>) attributes {dimension_semantics = [#tpu.dimension_semantics<parallel>], iteration_bounds = array<i64: 2>, scalar_prefetch = 0 : i64, scratch_operands = 0 : i64, tpu.core_type = #tpu.core_type<tc>, window_params = [{transform_indices = @transform_0, window_bounds = array<i64: 1, 1, 768>}, {pipeline_mode = #tpu.pipeline_mode<synchronous>, transform_indices = @transform_1, window_bounds = array<i64: 768, 32>}, {pipeline_mode = #tpu.pipeline_mode<synchronous>, transform_indices = @transform_2, window_bounds = array<i64: 1, 32>}, {transform_indices = @transform_3, window_bounds = array<i64: 1, 1, 32>}]} {
    %c0 = arith.constant 0 : index
    %c0_0 = arith.constant 0 : index
    %c0_1 = arith.constant 0 : index
    %0 = vector.load %arg1[%c0, %c0_0, %c0_1] : memref<1x1x768xf32, #tpu.memory_space<vmem>>, vector<1x1x768xf32>
    %1 = vector.shape_cast %0 : vector<1x1x768xf32> to vector<1x768xf32>
    %c0_2 = arith.constant 0 : index
    %c0_3 = arith.constant 0 : index
    %2 = vector.load %arg2[%c0_2, %c0_3] : memref<768x32xf32, #tpu.memory_space<vmem>>, vector<768x32xf32>
    %cst = arith.constant dense<0.000000e+00> : vector<1x32xf32>
    %3 = tpu.matmul %1, %2, %cst {dimension_numbers = #tpu.dot_dimension_numbers<[1], [0], [0], [1], [0, 0, 1, 1], [], []>} : vector<1x768xf32>, vector<768x32xf32>, vector<1x32xf32> -> vector<1x32xf32>
    %c0_4 = arith.constant 0 : index
    %c0_5 = arith.constant 0 : index
    %4 = vector.load %arg3[%c0_4, %c0_5] : memref<1x32xf32, #tpu.memory_space<vmem>>, vector<1x32xf32>
    %5 = arith.addf %3, %4 : vector<1x32xf32>
    %c0_6 = arith.constant 0 : index
    %c0_7 = arith.constant 0 : index
    %c0_8 = arith.constant 0 : index
    %6 = vector.load %arg4[%c0_6, %c0_7, %c0_8] : memref<1x1x32xf32, #tpu.memory_space<vmem>>, vector<1x1x32xf32>
    %7 = vector.shape_cast %6 : vector<1x1x32xf32> to vector<1x32xf32>
    %8 = vector.shape_cast %5 : vector<1x32xf32> to vector<1x1x32xf32>
    tpu.vector_store %arg4[%c0_6, %c0_7, %c0_8], %8 {strides = array<i32>} : memref<1x1x32xf32, #tpu.memory_space<vmem>>, vector<1x1x32xf32>,
    return
  }
  func.func @transform_0(%arg0: i32) -> (i32, i32, i32) {
    %c0_i32 = arith.constant 0 : i32
    %c0_i32_0 = arith.constant 0 : i32
    %c0_i32_1 = arith.constant 0 : i32
    return %arg0, %c0_i32, %c0_i32_0 : i32, i32, i32
  }
  func.func @transform_1(%arg0: i32) -> (i32, i32) {
    %c0_i32 = arith.constant 0 : i32
    %c0_i32_0 = arith.constant 0 : i32
    %c0_i32_1 = arith.constant 0 : i32
    return %c0_i32, %c0_i32_0 : i32, i32
  }
  func.func @transform_2(%arg0: i32) -> (i32, i32) {
    %c0_i32 = arith.constant 0 : i32
    %c0_i32_0 = arith.constant 0 : i32
    %c0_i32_1 = arith.constant 0 : i32
    return %c0_i32, %c0_i32_0 : i32, i32
  }
  func.func @transform_3(%arg0: i32) -> (i32, i32, i32) {
    %c0_i32 = arith.constant 0 : i32
    %c0_i32_0 = arith.constant 0 : i32
    %c0_i32_1 = arith.constant 0 : i32
    return %arg0, %c0_i32, %c0_i32_0 : i32, i32, i32
  }
}

</mosaic_0001>

<bundles_post_ra>
// kernel: clip_forward.1
= control target key start
LH: loop header
LB: loop body
LE: loop exit
PB: predicated region body
PF: predicated region fallthrough
CT: control target
= control target key end

     0   :  { %s797_s12 = smov 0   ;;  %s1135_s0 = inlined_call_operand.vmem [shape: f32[2,1,768], index: 0, kind: input, shape index: {}]   ;;  %s1136_s1 = inlined_call_operand.vmem [shape: f32[768,32], index: 1, kind: input, shape index: {}]   ;;  %s1137_s2 = inlined_call_operand.vmem [shape: f32[1,32], index: 2, kind: input, shape index: {}]   ;;  %s1138_s3 = inlined_call_operand.vmem [shape: f32[2,1,32], index: 3, kind: output, shape index: {}]  }
   0x1 LB: > { %s552_s13 = sadd.s32 4294967295, %s775_s12   ;;  %p556_p0 = scmp.ge.s32.totalorder %s775_s12, 1  ;;  %s775_s12 = sphi %s797_s12, %s13_s12  }
   0x2   : > { %p136_p1 = scmp.lt.s32.totalorder %s775_s12, 3 }
   0x4   : > { %p137_p2 = pnand %p556_p0, %p136_p1 }
   0x5   : > { %v181_v0 = vld [vmem:[%s1136_s1 + $0x80] sm:$0xff] (!%p137_p2)  ;;  %v182_v1 = vld [vmem:[%s1136_s1 + $0x88] sm:$0xff] (!%p137_p2)  ;;  %v183_v11 = vld [vmem:[%s1136_s1 + $0x90] sm:$0xff] (!%p137_p2)  ;;  %p861_p3 = scmp.lt.s32.totalorder (!%p137_p2), %s552_s13, 1  ;;  %v263_v43 = vlaneseq (!%p137_p2)  ;;  %vm503_vm0 = vcmask (!%p137_p2), 253952  }
   0x6   : > { %140 = sbr.rel (%p137_p2) target bundleno = 290 (0x122), region = 32  ;;  %v165_v2 = vld [vmem:[%s1136_s1] sm:$0xff] (!%p137_p2)  ;;  %v664_v3 = vpack.c.bf16 (!%p137_p2), %v182_v1, %v181_v0  ;;  %v166_v4 = vld [vmem:[%s1136_s1 + $0x8] sm:$0xff] (!%p137_p2)  ;;  %v184_v13 = vld [vmem:[%s1136_s1 + $0x98] sm:$0xff] (!%p137_p2) }
   0x7   : > { %v213_v5 = vld [vmem:[%s1136_s1 + $0x180] sm:$0xff] (!%p137_p2)  ;;  %v214_v6 = vld [vmem:[%s1136_s1 + $0x188] sm:$0xff] (!%p137_p2)  ;;  %v666_v7 = vpack.c.bf16 (!%p137_p2), %v166_v4, %v165_v2  ;;  %v167_v14 = vld [vmem:[%s1136_s1 + $0x10] sm:$0xff] (!%p137_p2)  ;;  %v668_v16 = vpack.c.bf16 (!%p137_p2), %v184_v13, %v183_v11  ;;  %v935_v57 = vshrl.u32 (!%p137_p2), %v263_v43, 7 }
   0x8   : > { %v696_v8 = vpack.c.bf16 (!%p137_p2), %v214_v6, %v213_v5  ;;  %v197_v9 = vld [vmem:[%s1136_s1 + $0x100] sm:$0xff] (!%p137_p2)  ;;  %v198_v10 = vld [vmem:[%s1136_s1 + $0x108] sm:$0xff] (!%p137_p2)  ;;  %665 = vmatprep.subr.bf16.mxu0 (!%p137_p2), %v664_v3  ;;  %v168_v15 = vld [vmem:[%s1136_s1 + $0x18] sm:$0xff] (!%p137_p2) }
   0x9   : > { %v698_v12 = vpack.c.bf16 (!%p137_p2), %v198_v10, %v197_v9  ;;  %667 = vmatpush3.bf16.msra.mxu0 (!%p137_p2), %v666_v7  ;;  %v670_v17 = vpack.c.bf16 (!%p137_p2), %v168_v15, %v167_v14  ;;  %v215_v18 = vld [vmem:[%s1136_s1 + $0x190] sm:$0xff] (!%p137_p2)  ;;  %v216_v19 = vld [vmem:[%s1136_s1 + $0x198] sm:$0xff] (!%p137_p2)  ;;  %v185_v23 = vld [vmem:[%s1136_s1 + $0xa0] sm:$0xff] (!%p137_p2)  ;;  %v269_v6 = vsub.s32 (!%p137_p2), 1, %v935_v57  ;;  %v277_v11 = vsub.s32 (!%p137_p2), 3, %v935_v57 }
   0xa   : > { %697 = vmatprep.subr.bf16.mxu1 (!%p137_p2), %v696_v8  ;;  %v199_v20 = vld [vmem:[%s1136_s1 + $0x110] sm:$0xff] (!%p137_p2)  ;;  %v700_v21 = vpack.c.bf16 (!%p137_p2), %v216_v19, %v215_v18  ;;  %v200_v22 = vld [vmem:[%s1136_s1 + $0x118] sm:$0xff] (!%p137_p2)  ;;  %v186_v24 = vld [vmem:[%s1136_s1 + $0xa8] sm:$0xff] (!%p137_p2)  ;;  %669 = vmatprep.subr.bf16.mxu0 (!%p137_p2), %v668_v16 }
   0xb   : > { %699 = vmatpush3.bf16.msra.mxu1 (!%p137_p2), %v698_v12  ;;  %v702_v25 = vpack.c.bf16 (!%p137_p2), %v200_v22, %v199_v20  ;;  %v672_v26 = vpack.c.bf16 (!%p137_p2), %v186_v24, %v185_v23  ;;  %v169_v27 = vld [vmem:[%s1136_s1 + $0x20] sm:$0xff] (!%p137_p2)  ;;  %v170_v28 = vld [vmem:[%s1136_s1 + $0x28] sm:$0xff] (!%p137_p2)  ;;  %v187_v35 = vld [vmem:[%s1136_s1 + $0xb0] sm:$0xff] (!%p137_p2) }
   0xc   : > { %v217_v29 = vld [vmem:[%s1136_s1 + $0x1a0] sm:$0xff] (!%p137_p2)  ;;  %701 = vmatprep.subr.bf16.mxu1 (!%p137_p2), %v700_v21  ;;  %v218_v30 = vld [vmem:[%s1136_s1 + $0x1a8] sm:$0xff] (!%p137_p2)  ;;  %v674_v33 = vpack.c.bf16 (!%p137_p2), %v170_v28, %v169_v27  ;;  %v188_v36 = vld [vmem:[%s1136_s1 + $0xb8] sm:$0xff] (!%p137_p2) }
   0xd   : > { %v201_v31 = vld [vmem:[%s1136_s1 + $0x120] sm:$0xff]  ;;  %v202_v32 = vld [vmem:[%s1136_s1 + $0x128] sm:$0xff]  ;;  %671 = vmatpush3.bf16.msra.mxu0 %v670_v17  ;;  %v704_v34 = vpack.c.bf16 %v218_v30, %v217_v29  ;;  %v171_v37 = vld [vmem:[%s1136_s1 + $0x30] sm:$0xff]  ;;  %v676_v39 = vpack.c.bf16 %v188_v36, %v187_v35  ;;  %s1141_s13 = smov (!%p861_p3, %s552_s13), 1 }
   0xe   : > { %673 = vmatprep.subr.bf16.mxu0 %v672_v26  ;;  %v706_v38 = vpack.c.bf16 %v202_v32, %v201_v31  ;;  %v172_v40 = vld [vmem:[%s1136_s1 + $0x38] sm:$0xff]  ;;  %v219_v41 = vld [vmem:[%s1136_s1 + $0x1b0] sm:$0xff]  ;;  %v189_v47 = vld [vmem:[%s1136_s1 + $0xc0] sm:$0xff]  ;;  %s760_s18 = smul.u32 6, %s1141_s13  ;;  %s163_s15 = scalar_lea.vmem %s1138_s3, %s1141_s13 }
   0xf   : > { %703 = vmatpush3.bf16.msra.mxu1 %v702_v25  ;;  %v220_v42 = vld [vmem:[%s1136_s1 + $0x1b8] sm:$0xff]  ;;  %v203_v45 = vld [vmem:[%s1136_s1 + $0x130] sm:$0xff]  ;;  %v190_v48 = vld [vmem:[%s1136_s1 + $0xc8] sm:$0xff]  ;;  %v678_v49 = vpack.c.bf16 %v172_v40, %v171_v37 }
  0x10   : > { %705 = vmatprep.subr.bf16.mxu1 %v704_v34  ;;  %v708_v44 = vpack.c.bf16 %v220_v42, %v219_v41  ;;  %v204_v46 = vld [vmem:[%s1136_s1 + $0x138] sm:$0xff]  ;;  %v221_v50 = vld [vmem:[%s1136_s1 + $0x1c0] sm:$0xff]  ;;  %v222_v51 = vld [vmem:[%s1136_s1 + $0x1c8] sm:$0xff]  ;;  %v680_v53 = vpack.c.bf16 %v190_v48, %v189_v47  ;;  %s160_s10 = scalar_lea.vmem %s1135_s0, %s760_s18  ;;  %v273_v41 = vsub.s32 2, %v935_v57 }
  0x11   : > { %675 = vmatpush3.bf16.msra.mxu0 %v674_v33  ;;  %v710_v52 = vpack.c.bf16 %v204_v46, %v203_v45  ;;  %v173_v54 = vld [vmem:[%s1136_s1 + $0x40] sm:$0xff]  ;;  %v174_v55 = vld [vmem:[%s1136_s1 + $0x48] sm:$0xff]  ;;  %v712_v58 = vpack.c.bf16 %v222_v51, %v221_v50  ;;  %v191_v60 = vld [vmem:[%s1136_s1 + $0xd0] sm:$0xff]  ;;  %v285_v46 = vsub.s32 5, %v935_v57 }
  0x12   : > { %677 = vmatprep.subr.bf16.mxu0 %v676_v39  ;;  %v205_v56 = vld [vmem:[%s1136_s1 + $0x140] sm:$0xff]  ;;  %v206_v59 = vld [vmem:[%s1136_s1 + $0x148] sm:$0xff]  ;;  %v192_v61 = vld [vmem:[%s1136_s1 + $0xd8] sm:$0xff]  ;;  %v682_v0 = vpack.c.bf16 %v174_v55, %v173_v54  ;;  %v265_v39 = vsub.s32 0, %v935_v57 }
  0x13   : > { %707 = vmatpush3.bf16.msra.mxu1 %v706_v38  ;;  %v223_v62 = vld [vmem:[%s1136_s1 + $0x1d0] sm:$0xff]  ;;  %v224_v63 = vld [vmem:[%s1136_s1 + $0x1d8] sm:$0xff]  ;;  %v714_v1 = vpack.c.bf16 %v206_v59, %v205_v56  ;;  %v684_v2 = vpack.c.bf16 %v192_v61, %v191_v60  ;;  %v193_v9 = vld [vmem:[%s1136_s1 + $0xe0] sm:$0xff] }
  0x14   : > { %709 = vmatprep.subr.bf16.mxu1 %v708_v44  ;;  %v175_v3 = vld [vmem:[%s1136_s1 + $0x50] sm:$0xff]  ;;  %v176_v4 = vld [vmem:[%s1136_s1 + $0x58] sm:$0xff]  ;;  %v716_v7 = vpack.c.bf16 %v224_v63, %v223_v62  ;;  %v194_v10 = vld [vmem:[%s1136_s1 + $0xe8] sm:$0xff] }
  0x15   : > { %679 = vmatpush3.bf16.msra.mxu0 %v678_v49  ;;  %v207_v5 = vld [vmem:[%s1136_s1 + $0x150] sm:$0xff]  ;;  %v208_v8 = vld [vmem:[%s1136_s1 + $0x158] sm:$0xff]  ;;  %v225_v12 = vld [vmem:[%s1136_s1 + $0x1e0] sm:$0xff]  ;;  %v686_v14 = vpack.c.bf16 %v176_v4, %v175_v3  ;;  %v688_v17 = vpack.c.bf16 %v194_v10, %v193_v9 }
  0x16   : > { %681 = vmatprep.subr.bf16.mxu0 %v680_v53  ;;  %v226_v13 = vld [vmem:[%s1136_s1 + $0x1e8] sm:$0xff]  ;;  %v981_v15 = vld [vmem:[%s160_s10] sm:$0x3f]  ;;  %v718_v16 = vpack.c.bf16 %v208_v8, %v207_v5  ;;  %v195_v24 = vld [vmem:[%s1136_s1 + $0xf0] sm:$0xff] }
  0x17   : > { %711 = vmatpush3.bf16.msra.mxu1 %v710_v52  ;;  %v177_v18 = vld [vmem:[%s1136_s1 + $0x60] sm:$0xff]  ;;  %v178_v19 = vld [vmem:[%s1136_s1 + $0x68] sm:$0xff]  ;;  %v270_v21 = vrot.slane %v981_v15, %v269_v6  ;;  %v720_v22 = vpack.c.bf16 %v226_v13, %v225_v12  ;;  %v196_v25 = vld [vmem:[%s1136_s1 + $0xf8] sm:$0xff]  ;;  %v278_v26 = vrot.slane %v981_v15, %v277_v11  ;;  %v266_v49 = vrot.slane %v981_v15, %v265_v39 }
  0x18   : > { %713 = vmatprep.subr.bf16.mxu1 %v712_v58  ;;  %v209_v20 = vld [vmem:[%s1136_s1 + $0x160] sm:$0xff]  ;;  %v210_v23 = vld [vmem:[%s1136_s1 + $0x168] sm:$0xff]  ;;  %v227_v27 = vld [vmem:[%s1136_s1 + $0x1f0] sm:$0xff]  ;;  %v690_v29 = vpack.c.bf16 %v178_v19, %v177_v18  ;;  %v692_v31 = vpack.c.bf16 %v196_v25, %v195_v24  ;;  %v274_v51 = vrot.slane %v981_v15, %v273_v41  ;;  %v286_v55 = vrot.slane %v981_v15, %v285_v46 }
  0x19   : > { %683 = vmatpush3.bf16.msra.mxu0 %v682_v0  ;;  %v228_v28 = vld [vmem:[%s1136_s1 + $0x1f8] sm:$0xff]  ;;  %357 = vmatprep.mubr.f32.mxu0 %v270_v21  ;;  %v722_v30 = vpack.c.bf16 %v210_v23, %v209_v20  ;;  %v179_v32 = vld [vmem:[%s1136_s1 + $0x70] sm:$0xff]  ;;  %v245_v37 = vld [vmem:[%s1136_s1 + $0x280] sm:$0xff] }
  0x1a   : > { %685 = vmatprep.subr.bf16.mxu0 %v684_v2  ;;  %427 = vmatprep.mubr.f32.mxu1 %v278_v26  ;;  %v180_v33 = vld [vmem:[%s1136_s1 + $0x78] sm:$0xff]  ;;  %v211_v34 = vld [vmem:[%s1136_s1 + $0x170] sm:$0xff]  ;;  %v724_v35 = vpack.c.bf16 %v228_v28, %v227_v27  ;;  %v246_v38 = vld [vmem:[%s1136_s1 + $0x288] sm:$0xff] }
  0x1b   : > { %715 = vmatpush3.bf16.msra.mxu1 %v714_v1  ;;  %v212_v36 = vld [vmem:[%s1136_s1 + $0x178] sm:$0xff]  ;;  %v694_v40 = vpack.c.bf16 %v180_v33, %v179_v32  ;;  %v728_v43 = vpack.c.bf16 %v246_v38, %v245_v37  ;;  %v229_v44 = vld [vmem:[%s1136_s1 + $0x200] sm:$0xff]  ;;  %v230_v45 = vld [vmem:[%s1136_s1 + $0x208] sm:$0xff] }
  0x1c   : > { %717 = vmatprep.subr.bf16.mxu1 %v716_v7  ;;  %v726_v42 = vpack.c.bf16 %v212_v36, %v211_v34  ;;  %v247_v47 = vld [vmem:[%s1136_s1 + $0x290] sm:$0xff]  ;;  %v248_v48 = vld [vmem:[%s1136_s1 + $0x298] sm:$0xff]  ;;  %v730_v50 = vpack.c.bf16 %v230_v45, %v229_v44  ;;  %v249_v56 = vld [vmem:[%s1136_s1 + $0x2a0] sm:$0xff] }
  0x1d   : > { %687 = vmatpush3.bf16.msra.mxu0 %v686_v14  ;;  %v732_v52 = vpack.c.bf16 %v248_v48, %v247_v47  ;;  %v231_v53 = vld [vmem:[%s1136_s1 + $0x210] sm:$0xff]  ;;  %v232_v54 = vld [vmem:[%s1136_s1 + $0x218] sm:$0xff]  ;;  %v250_v58 = vld [vmem:[%s1136_s1 + $0x2a8] sm:$0xff] }
  0x1e   : > { %689 = vmatprep.subr.bf16.mxu0 %v688_v17  ;;  %v734_v59 = vpack.c.bf16 %v232_v54, %v231_v53  ;;  %v736_v60 = vpack.c.bf16 %v250_v58, %v249_v56  ;;  %v233_v61 = vld [vmem:[%s1136_s1 + $0x220] sm:$0xff]  ;;  %v234_v62 = vld [vmem:[%s1136_s1 + $0x228] sm:$0xff]  ;;  %v251_v63 = vld [vmem:[%s1136_s1 + $0x2b0] sm:$0xff] }
  0x1f   : > { %719 = vmatpush3.bf16.msra.mxu1 %v718_v16  ;;  %v252_v0 = vld [vmem:[%s1136_s1 + $0x2b8] sm:$0xff]  ;;  %v738_v1 = vpack.c.bf16 %v234_v62, %v233_v61  ;;  %v235_v3 = vld [vmem:[%s1136_s1 + $0x230] sm:$0xff]  ;;  %v253_v5 = vld [vmem:[%s1136_s1 + $0x2c0] sm:$0xff] }
  0x20   : > { %721 = vmatprep.subr.bf16.mxu1 %v720_v22  ;;  %v740_v2 = vpack.c.bf16 %v252_v0, %v251_v63  ;;  %v236_v4 = vld [vmem:[%s1136_s1 + $0x238] sm:$0xff]  ;;  %v254_v6 = vld [vmem:[%s1136_s1 + $0x2c8] sm:$0xff]  ;;  %v237_v9 = vld [vmem:[%s1136_s1 + $0x240] sm:$0xff] }
  0x21   : > { %691 = vmatpush3.bf16.msra.mxu0 %v690_v29  ;;  %v742_v7 = vpack.c.bf16 %v236_v4, %v235_v3  ;;  %v744_v8 = vpack.c.bf16 %v254_v6, %v253_v5  ;;  %v238_v10 = vld [vmem:[%s1136_s1 + $0x248] sm:$0xff]  ;;  %v255_v11 = vld [vmem:[%s1136_s1 + $0x2d0] sm:$0xff]  ;;  %v256_v12 = vld [vmem:[%s1136_s1 + $0x2d8] sm:$0xff] }
  0x22   : > { %693 = vmatprep.subr.bf16.mxu0 %v692_v31  ;;  %v746_v13 = vpack.c.bf16 %v238_v10, %v237_v9  ;;  %v748_v14 = vpack.c.bf16 %v256_v12, %v255_v11  ;;  %v239_v16 = vld [vmem:[%s1136_s1 + $0x250] sm:$0xff]  ;;  %v240_v17 = vld [vmem:[%s1136_s1 + $0x258] sm:$0xff]  ;;  %v257_v18 = vld [vmem:[%s1136_s1 + $0x2e0] sm:$0xff] }
  0x23   : > { %723 = vmatpush3.bf16.msra.mxu1 %v722_v30  ;;  %v258_v19 = vld [vmem:[%s1136_s1 + $0x2e8] sm:$0xff]  ;;  %v750_v20 = vpack.c.bf16 %v240_v17, %v239_v16  ;;  %v241_v22 = vld [vmem:[%s1136_s1 + $0x260] sm:$0xff]  ;;  %v259_v24 = vld [vmem:[%s1136_s1 + $0x2f0] sm:$0xff]  ;;  %v281_v30 = vsub.s32 4, %v935_v57 }
  0x24   : > { %725 = vmatprep.subr.bf16.mxu1 %v724_v35  ;;  %v752_v21 = vpack.c.bf16 %v258_v19, %v257_v18  ;;  %v242_v23 = vld [vmem:[%s1136_s1 + $0x268] sm:$0xff]  ;;  %v260_v25 = vld [vmem:[%s1136_s1 + $0x2f8] sm:$0xff]  ;;  %v243_v28 = vld [vmem:[%s1136_s1 + $0x270] sm:$0xff] }
  0x25   : > { %695 = vmatpush3.bf16.msra.mxu0 %v694_v40  ;;  %v754_v26 = vpack.c.bf16 %v242_v23, %v241_v22  ;;  %v756_v27 = vpack.c.bf16 %v260_v25, %v259_v24  ;;  %v244_v29 = vld [vmem:[%s1136_s1 + $0x278] sm:$0xff]  ;;  %v282_v32 = vrot.slane %v981_v15, %v281_v30  ;;  %v261_v34 = vld [vmem:[%s1137_s2] sm:$0x1] }
  0x26   : > { %729 = vmatprep.subr.bf16.mxu0 %v728_v43  ;;  %v758_v31 = vpack.c.bf16 %v244_v29, %v243_v28 }
  0x27   : > { %727 = vmatpush3.bf16.msra.mxu1 %v726_v42 }
  0x28   : > { %358 = vmatmul.mubr.f32.vlgmr.msra.gmra.mrb[0].mxu0 %v266_v49 }
  0x29   : > { %731 = vmatpush3.bf16.msra.mxu0 %v730_v50  ;;  %497 = vmatprep.mubr.f32.mxu0 %v286_v55 }
  0x2a   : > { %428 = vmatmul.mubr.f32.vlgmr.msra.gmra.mrb[0].mxu1 %v274_v51  ;;  %733 = vmatprep.subr.bf16.mxu0 %v732_v52 }
  0x2d   : > { %735 = vmatpush3.bf16.msra.mxu0 %v734_v59 }
  0x2e   : > { %737 = vmatprep.subr.bf16.mxu0 %v736_v60 }
  0x31   : > { %739 = vmatpush3.bf16.msra.mxu0 %v738_v1 }
  0x32   : > { %741 = vmatprep.subr.bf16.mxu0 %v740_v2 }
  0x35   : > { %743 = vmatpush3.bf16.msra.mxu0 %v742_v7 }
  0x36   : > { %745 = vmatprep.subr.bf16.mxu0 %v744_v8 }
  0x39   : > { %747 = vmatpush3.bf16.msra.mxu0 %v746_v13 }
  0x3a   : > { %749 = vmatprep.subr.bf16.mxu0 %v748_v14 }
  0x3d   : > { %751 = vmatpush3.bf16.msra.mxu0 %v750_v20 }
  0x3e   : > { %753 = vmatprep.subr.bf16.mxu0 %v752_v21 }
  0x41   : > { %755 = vmatpush3.bf16.msra.mxu0 %v754_v26 }
  0x42   : > { %757 = vmatprep.subr.bf16.mxu0 %v756_v27 }
  0x45   : > { %759 = vmatpush3.bf16.msra.mxu0 %v758_v31 }
  0x48   : > { %498 = vmatmul.mubr.f32.vlgmr.msra.gmra.mrb[2].mxu0 %v282_v32 }
  0xfb   : > { %v591_v33 = vpop.f32.mrb[0].mxu0 }
  0xfc   : > { %v592_v35 = vpop.f32.mrb[1].mxu0 }
  0xfd   : > { %v626_v36 = vpop.f32.mrb[0].mxu1  ;;  %v593_v37 = vadd.f32 %v592_v35, %v591_v33 }
  0xfe   : > { %v627_v38 = vpop.f32.mrb[1].mxu1 }
  0xff   : > { %v628_v39 = vadd.f32 %v627_v38, %v626_v36  ;;  %v360_v40 = vadd.f32 %v593_v37, %v261_v34 }
 0x101   : > { %v430_v57 = vadd.f32 %v628_v39, %v360_v40 }
 0x11b   : > { %v661_v41 = vpop.f32.mrb[2].mxu0 }
 0x11c   : > { %v662_v42 = vpop.f32.mrb[3].mxu0 }
 0x11d   : > { %v663_v43 = vadd.f32 %v662_v42, %v661_v41 }
 0x11f   : > { %v500_v15 = vadd.f32 %v663_v43, %v430_v57 }
 0x121   : > { %504 = vst.msk [vmem:[%s163_s15] sm:$0x1] %vm503_vm0, %v500_v15 }
 0x122 PF: > { %s13_s12 = sadd.s32 1, %s775_s12  }
 0x123   : > { %p10_p4 = scmp.ge.s32.totalorder %s13_s12, 4  }
 0x125   :  { %12 = sbr.rel (!%p10_p4) target bundleno = 1 (0x1), region = 62 }

</bundles_post_ra>
